<compile_context>
chip_gen: v7x
topology: tpu7x:2x2x1
jax: 0.10.0
libtpu: 0.0.40
codegen_flags: <defaults>
</compile_context>

<pallas_src>
import jax
import jax.numpy as jnp
from jax.experimental import pallas as pl
from jax.experimental.pallas import tpu as pltpu


_LANE = 128
# Everything is one VMEM-resident block set; keep well under v7x's 64 MiB VMEM.
_VMEM_SOFT_LIMIT_BYTES = 16 * 1024 * 1024


def _make_reg_kernel(num_weights):
    """Builds a kernel computing weight_decay * sum_w ||w||_2.

    Kernel args: (wd_ref [SMEM (1,1)], w_ref_0..w_ref_{W-1} [VMEM (r_i,128)],
                  o_ref [VMEM (1,1)]).
    """

    def kernel(wd_ref, *refs):
        w_refs = refs[:num_weights]
        o_ref = refs[num_weights]

        total = jnp.zeros((1, 1), jnp.float32)
        for w_ref in w_refs:
            # Widen-on-read: if weights are bf16 upstream, DMA them narrow and
            # square/accumulate in f32 on the VPU.
            x = w_ref[...].astype(jnp.float32)              # (rows, 128)
            sq = x * x
            # Sublane/row axis first: almost all work is 4-wide co-issued VPU
            # adds and the partial stays lane-dense.
            partial = jnp.sum(sq, axis=0, keepdims=True)    # (1, 128)
            # Exactly one cross-lane (XLU) reduce per tensor.
            ssq = jnp.sum(partial, axis=1, keepdims=True)   # (1, 1)
            total = total + jnp.sqrt(ssq)                   # per-tensor L2 norm

        # Runtime weight_decay from SMEM: no recompilation when it changes.
        o_ref[...] = wd_ref[0, 0] * total

    return kernel


@jax.jit
def _reg_loss_impl(weights, weight_decay):
    """weights: tuple of raw weight arrays (any shape / dtype)."""
    padded = []
    n_real = 0
    vmem_bytes = 0
    for w in weights:
        flat = jnp.ravel(w)                      # keep original dtype
        n = flat.shape[0]
        n_real += n
        rows = -(-n // _LANE)                    # ceil(n / 128)
        pad = rows * _LANE - n
        if pad:
            flat = jnp.pad(flat, (0, pad))       # zero pad: exact for sum-of-squares
        padded.append(flat.reshape(rows, _LANE))
        vmem_bytes += rows * _LANE * flat.dtype.itemsize

    # Single-block design: all weights must comfortably fit VMEM (64 MiB on
    # v7x, 128 MiB on v5e/v6e).
    # TODO(synk): fall back to a gridded accumulator kernel if this utility is
    # ever reused on models whose packed weights exceed the soft limit.
    assert vmem_bytes < _VMEM_SOFT_LIMIT_BYTES, (
        f"packed weights ({vmem_bytes} B) too large for single-block kernel")

    num_weights = len(padded)
    kernel = _make_reg_kernel(num_weights)
    wd = jnp.reshape(weight_decay.astype(jnp.float32), (1, 1))

    out = pl.pallas_call(
        kernel,
        out_shape=jax.ShapeDtypeStruct((1, 1), jnp.float32),
        in_specs=[pl.BlockSpec(memory_space=pltpu.MemorySpace.SMEM)]
        + [pl.BlockSpec(memory_space=pltpu.MemorySpace.VMEM)] * num_weights,
        out_specs=pl.BlockSpec(memory_space=pltpu.MemorySpace.VMEM),
        cost_estimate=pl.CostEstimate(
            flops=2 * n_real + 2 * num_weights,
            transcendentals=num_weights,          # one sqrt per tensor
            bytes_accessed=vmem_bytes + 4 + 4,
        ),
    )(wd, *padded)
    return out[0, 0]


def regularization_loss_pallas(weight_list, weight_decay, p=2):
    """weight_list: list of (name, array) pairs, mirrors Regularization.get_weight.

    Computes weight_decay * sum_w ||w||_2 with all norm/sum work in one Pallas
    kernel invocation.
    """
    # TODO(synk): only p=2 (torch.norm default / Frobenius) is implemented.
    assert p == 2, "only p=2 is implemented"
    arrays = tuple(w for _, w in weight_list)
    return _reg_loss_impl(arrays, jnp.float32(weight_decay))


def make_synthetic_mtcnn_weights(key):
    """Deterministic synthetic 'model.named_parameters()' weights
    (PNet-like shapes from the MTCNN codebase; only names containing
    'weight' would be collected by Regularization.get_weight)."""
    shapes = [
        ("pre_layer.0.weight", (10, 3, 3, 3)),    # conv1 (OIHW)
        ("pre_layer.1.weight", (10,)),            # prelu1
        ("pre_layer.3.weight", (16, 10, 3, 3)),   # conv2
        ("pre_layer.4.weight", (16,)),            # prelu2
        ("pre_layer.5.weight", (32, 16, 3, 3)),   # conv3
        ("pre_layer.6.weight", (32,)),            # prelu3
        ("conv4_1.weight", (2, 32, 1, 1)),        # face cls head
        ("conv4_2.weight", (4, 32, 1, 1)),        # bbox reg head
    ]
    weight_list = []
    for i, (name, shp) in enumerate(shapes):
        k = jax.random.fold_in(key, i)
        weight_list.append((name, jax.random.normal(k, shp, dtype=jnp.float32)))
    return weight_list


if __name__ == "__main__":
    key = jax.random.PRNGKey(0)
    weight_decay = 1e-3

    weight_list = make_synthetic_mtcnn_weights(key)

    loss = regularization_loss_pallas(weight_list, weight_decay, p=2)
    loss = jax.block_until_ready(loss)

    # Reference (plain JAX) check of the exact torch semantics:
    # weight_decay * sum_w sqrt(sum(w**2))
    ref = weight_decay * sum(
        jnp.sqrt(jnp.sum(jnp.square(w.astype(jnp.float32)))) for _, w in weight_list
    )
    assert jnp.allclose(loss, ref, rtol=1e-5, atol=1e-6), (loss, ref)

    print("KERNEL_OK")
</pallas_src>

<mosaic_0001>
module attributes {stable_mosaic.version = 11 : i64} {
  func.func @kernel(%arg0: memref<1x1xf32, #tpu.memory_space<smem>>, %arg1: memref<3x128xf32, #tpu.memory_space<vmem>>, %arg2: memref<1x128xf32, #tpu.memory_space<vmem>>, %arg3: memref<12x128xf32, #tpu.memory_space<vmem>>, %arg4: memref<1x128xf32, #tpu.memory_space<vmem>>, %arg5: memref<36x128xf32, #tpu.memory_space<vmem>>, %arg6: memref<1x128xf32, #tpu.memory_space<vmem>>, %arg7: memref<1x128xf32, #tpu.memory_space<vmem>>, %arg8: memref<1x128xf32, #tpu.memory_space<vmem>>, %arg9: memref<1x1xf32, #tpu.memory_space<vmem>>) attributes {dimension_semantics = [], scalar_prefetch = 0 : i64, scratch_operands = 0 : i64, tpu.core_type = #tpu.core_type<tc>} {
    %cst = arith.constant 0.000000e+00 : f32
    %0 = vector.broadcast %cst : f32 to vector<1x1xf32>
    %c0 = arith.constant 0 : index
    %c0_0 = arith.constant 0 : index
    %1 = vector.load %arg1[%c0, %c0_0] : memref<3x128xf32, #tpu.memory_space<vmem>>, vector<3x128xf32>
    %2 = arith.mulf %1, %1 : vector<3x128xf32>
    %cst_1 = arith.constant dense<0.000000e+00> : vector<128xf32>
    %3 = vector.multi_reduction <add>, %2, %cst_1 [0] : vector<3x128xf32> to vector<128xf32>
    %4 = vector.shape_cast %3 : vector<128xf32> to vector<1x128xf32>
    %cst_2 = arith.constant dense<0.000000e+00> : vector<1xf32>
    %5 = vector.multi_reduction <add>, %4, %cst_2 [1] : vector<1x128xf32> to vector<1xf32>
    %6 = vector.shape_cast %5 : vector<1xf32> to vector<1x1xf32>
    %7 = math.sqrt %6 : vector<1x1xf32>
    %8 = arith.addf %0, %7 : vector<1x1xf32>
    %c0_3 = arith.constant 0 : index
    %c0_4 = arith.constant 0 : index
    %9 = vector.load %arg2[%c0_3, %c0_4] : memref<1x128xf32, #tpu.memory_space<vmem>>, vector<1x128xf32>
    %10 = arith.mulf %9, %9 : vector<1x128xf32>
    %cst_5 = arith.constant dense<0.000000e+00> : vector<128xf32>
    %11 = vector.multi_reduction <add>, %10, %cst_5 [0] : vector<1x128xf32> to vector<128xf32>
    %12 = vector.shape_cast %11 : vector<128xf32> to vector<1x128xf32>
    %cst_6 = arith.constant dense<0.000000e+00> : vector<1xf32>
    %13 = vector.multi_reduction <add>, %12, %cst_6 [1] : vector<1x128xf32> to vector<1xf32>
    %14 = vector.shape_cast %13 : vector<1xf32> to vector<1x1xf32>
    %15 = math.sqrt %14 : vector<1x1xf32>
    %16 = arith.addf %8, %15 : vector<1x1xf32>
    %c0_7 = arith.constant 0 : index
    %c0_8 = arith.constant 0 : index
    %17 = vector.load %arg3[%c0_7, %c0_8] : memref<12x128xf32, #tpu.memory_space<vmem>>, vector<12x128xf32>
    %18 = arith.mulf %17, %17 : vector<12x128xf32>
    %cst_9 = arith.constant dense<0.000000e+00> : vector<128xf32>
    %19 = vector.multi_reduction <add>, %18, %cst_9 [0] : vector<12x128xf32> to vector<128xf32>
    %20 = vector.shape_cast %19 : vector<128xf32> to vector<1x128xf32>
    %cst_10 = arith.constant dense<0.000000e+00> : vector<1xf32>
    %21 = vector.multi_reduction <add>, %20, %cst_10 [1] : vector<1x128xf32> to vector<1xf32>
    %22 = vector.shape_cast %21 : vector<1xf32> to vector<1x1xf32>
    %23 = math.sqrt %22 : vector<1x1xf32>
    %24 = arith.addf %16, %23 : vector<1x1xf32>
    %c0_11 = arith.constant 0 : index
    %c0_12 = arith.constant 0 : index
    %25 = vector.load %arg4[%c0_11, %c0_12] : memref<1x128xf32, #tpu.memory_space<vmem>>, vector<1x128xf32>
    %26 = arith.mulf %25, %25 : vector<1x128xf32>
    %cst_13 = arith.constant dense<0.000000e+00> : vector<128xf32>
    %27 = vector.multi_reduction <add>, %26, %cst_13 [0] : vector<1x128xf32> to vector<128xf32>
    %28 = vector.shape_cast %27 : vector<128xf32> to vector<1x128xf32>
    %cst_14 = arith.constant dense<0.000000e+00> : vector<1xf32>
    %29 = vector.multi_reduction <add>, %28, %cst_14 [1] : vector<1x128xf32> to vector<1xf32>
    %30 = vector.shape_cast %29 : vector<1xf32> to vector<1x1xf32>
    %31 = math.sqrt %30 : vector<1x1xf32>
    %32 = arith.addf %24, %31 : vector<1x1xf32>
    %c0_15 = arith.constant 0 : index
    %c0_16 = arith.constant 0 : index
    %33 = vector.load %arg5[%c0_15, %c0_16] : memref<36x128xf32, #tpu.memory_space<vmem>>, vector<36x128xf32>
    %34 = arith.mulf %33, %33 : vector<36x128xf32>
    %cst_17 = arith.constant dense<0.000000e+00> : vector<128xf32>
    %35 = vector.multi_reduction <add>, %34, %cst_17 [0] : vector<36x128xf32> to vector<128xf32>
    %36 = vector.shape_cast %35 : vector<128xf32> to vector<1x128xf32>
    %cst_18 = arith.constant dense<0.000000e+00> : vector<1xf32>
    %37 = vector.multi_reduction <add>, %36, %cst_18 [1] : vector<1x128xf32> to vector<1xf32>
    %38 = vector.shape_cast %37 : vector<1xf32> to vector<1x1xf32>
    %39 = math.sqrt %38 : vector<1x1xf32>
    %40 = arith.addf %32, %39 : vector<1x1xf32>
    %c0_19 = arith.constant 0 : index
    %c0_20 = arith.constant 0 : index
    %41 = vector.load %arg6[%c0_19, %c0_20] : memref<1x128xf32, #tpu.memory_space<vmem>>, vector<1x128xf32>
    %42 = arith.mulf %41, %41 : vector<1x128xf32>
    %cst_21 = arith.constant dense<0.000000e+00> : vector<128xf32>
    %43 = vector.multi_reduction <add>, %42, %cst_21 [0] : vector<1x128xf32> to vector<128xf32>
    %44 = vector.shape_cast %43 : vector<128xf32> to vector<1x128xf32>
    %cst_22 = arith.constant dense<0.000000e+00> : vector<1xf32>
    %45 = vector.multi_reduction <add>, %44, %cst_22 [1] : vector<1x128xf32> to vector<1xf32>
    %46 = vector.shape_cast %45 : vector<1xf32> to vector<1x1xf32>
    %47 = math.sqrt %46 : vector<1x1xf32>
    %48 = arith.addf %40, %47 : vector<1x1xf32>
    %c0_23 = arith.constant 0 : index
    %c0_24 = arith.constant 0 : index
    %49 = vector.load %arg7[%c0_23, %c0_24] : memref<1x128xf32, #tpu.memory_space<vmem>>, vector<1x128xf32>
    %50 = arith.mulf %49, %49 : vector<1x128xf32>
    %cst_25 = arith.constant dense<0.000000e+00> : vector<128xf32>
    %51 = vector.multi_reduction <add>, %50, %cst_25 [0] : vector<1x128xf32> to vector<128xf32>
    %52 = vector.shape_cast %51 : vector<128xf32> to vector<1x128xf32>
    %cst_26 = arith.constant dense<0.000000e+00> : vector<1xf32>
    %53 = vector.multi_reduction <add>, %52, %cst_26 [1] : vector<1x128xf32> to vector<1xf32>
    %54 = vector.shape_cast %53 : vector<1xf32> to vector<1x1xf32>
    %55 = math.sqrt %54 : vector<1x1xf32>
    %56 = arith.addf %48, %55 : vector<1x1xf32>
    %c0_27 = arith.constant 0 : index
    %c0_28 = arith.constant 0 : index
    %57 = vector.load %arg8[%c0_27, %c0_28] : memref<1x128xf32, #tpu.memory_space<vmem>>, vector<1x128xf32>
    %58 = arith.mulf %57, %57 : vector<1x128xf32>
    %cst_29 = arith.constant dense<0.000000e+00> : vector<128xf32>
    %59 = vector.multi_reduction <add>, %58, %cst_29 [0] : vector<1x128xf32> to vector<128xf32>
    %60 = vector.shape_cast %59 : vector<128xf32> to vector<1x128xf32>
    %cst_30 = arith.constant dense<0.000000e+00> : vector<1xf32>
    %61 = vector.multi_reduction <add>, %60, %cst_30 [1] : vector<1x128xf32> to vector<1xf32>
    %62 = vector.shape_cast %61 : vector<1xf32> to vector<1x1xf32>
    %63 = math.sqrt %62 : vector<1x1xf32>
    %64 = arith.addf %56, %63 : vector<1x1xf32>
    %c0_31 = arith.constant 0 : index
    %c0_32 = arith.constant 0 : index
    %65 = memref.load %arg0[%c0_31, %c0_32] : memref<1x1xf32, #tpu.memory_space<smem>>
    %66 = vector.broadcast %65 : f32 to vector<1x1xf32>
    %67 = arith.mulf %66, %64 : vector<1x1xf32>
    %c0_33 = arith.constant 0 : index
    %c0_34 = arith.constant 0 : index
    %68 = vector.load %arg9[%c0_33, %c0_34] : memref<1x1xf32, #tpu.memory_space<vmem>>, vector<1x1xf32>
    tpu.vector_store %arg9[%c0_33, %c0_34], %67 {strides = array<i32>} : memref<1x1xf32, #tpu.memory_space<vmem>>, vector<1x1xf32>,
    return
  }
}

</mosaic_0001>

<bundles_post_ra>
// kernel: _reg_loss_impl.1
= control target key start
LH: loop header
LB: loop body
LE: loop exit
PB: predicated region body
PF: predicated region fallthrough
CT: control target
= control target key end

     0   :  { %vm36_vm0 = vcmask 1042432   ;;  %vm73_vm1 = vcmask 1043456   ;;  %s351_s0 = inlined_call_operand.<no memory space> [shape: f32[1,1], index: 0, kind: input, shape index: {}]   ;;  %s352_s1 = inlined_call_operand.vmem [shape: f32[3,128], index: 1, kind: input, shape index: {}]   ;;  %s353_s2 = inlined_call_operand.vmem [shape: f32[1,128], index: 2, kind: input, shape index: {}]   ;;  %s354_s3 = inlined_call_operand.vmem [shape: f32[12,128], index: 3, kind: input, shape index: {}]   ;;  %s355_s4 = inlined_call_operand.vmem [shape: f32[1,128], index: 4, kind: input, shape index: {}]   ;;  %s356_s5 = inlined_call_operand.vmem [shape: f32[36,128], index: 5, kind: input, shape index: {}]   ;;  %s357_s6 = inlined_call_operand.vmem [shape: f32[1,128], index: 6, kind: input, shape index: {}]   ;;  %s358_s7 = inlined_call_operand.vmem [shape: f32[1,128], index: 7, kind: input, shape index: {}]   ;;  %s359_s8 = inlined_call_operand.vmem [shape: f32[1,128], index: 8, kind: input, shape index: {}]   ;;  %s360_s9 = inlined_call_operand.hbm [shape: f32[1,1], index: 9, kind: output, shape index: {}]  }
   0x1   :  { %v34_v0 = vld [vmem:[%s352_s1] sm:$0x7]  ;;  %v70_v2 = vld [vmem:[%s354_s3 + $0x8] sm:$0xf]  ;;  %v108_v8 = vld [vmem:[%s356_s5 + $0x10] sm:$0xff] }
   0x2   :  { %v69_v1 = vld [vmem:[%s354_s3] sm:$0xff]  ;;  %v35_v3 = vmul.f32 %v34_v0, %v34_v0  ;;  %v72_v5 = vmul.f32 %v70_v2, %v70_v2  ;;  %v107_v7 = vld [vmem:[%s356_s5 + $0x8] sm:$0xff]  ;;  %v109_v9 = vld [vmem:[%s356_s5 + $0x18] sm:$0xff]  ;;  %v113_v15 = vmul.f32 %v108_v8, %v108_v8 }
   0x3   :  { %v71_v4 = vmul.f32 %v69_v1, %v69_v1  ;;  %v106_v6 = vld [vmem:[%s356_s5] sm:$0xff]  ;;  %v112_v14 = vmul.f32 %v107_v7, %v107_v7  ;;  %v114_v18 = vmul.f32 %v109_v9, %v109_v9 }
   0x4   :  { %v111_v10 = vmul.f32 %v106_v6, %v106_v6  ;;  %v37_v11 = vsel %vm36_vm0, %v35_v3, 0.0  ;;  %v74_v12 = vsel %vm73_vm1, %v72_v5, 0.0  ;;  %v110_v13 = vld [vmem:[%s356_s5 + $0x20] sm:$0xf] }
   0x5   :  { %v38_v16 = vrot.slane %v37_v11, 4  ;;  %v75_v17 = vadd.f32 %v74_v12, %v71_v4  ;;  %v115_v19 = vmul.f32 %v110_v13, %v110_v13 }
   0x6   :  { %v116_v20 = vadd.f32 %v112_v14, %v111_v10 }
   0x7   :  { %15 = vsyncpa [#allocation4], 0  ;;  %v39_v21 = vadd.f32 %v38_v16, %v37_v11  ;;  %v76_v22 = vrot.slane %v75_v17, 4  ;;  %v119_v26 = vsel %vm73_vm1, %v115_v19, 0.0  ;;  %v54_v30 = vld [vmem:[%s353_s2] sm:$0x1] }
   0x8   :  { %v117_v23 = vadd.f32 %v116_v20, %v113_v15  ;;  %v92_v34 = vld [vmem:[%s355_s4] sm:$0x1]  ;;  %v55_v35 = vmul.f32 %v54_v30, %v54_v30  ;;  %vm57_vm2 = vcmask 1040384  }
   0x9   :  { %v40_v24 = vrot.slane %v39_v21, 2  ;;  %v77_v25 = vadd.f32 %v76_v22, %v75_v17  ;;  %v93_v39 = vmul.f32 %v92_v34, %v92_v34  ;;  %v137_v42 = vld [vmem:[%s357_s6] sm:$0x1] }
   0xa   :  { %v118_v27 = vadd.f32 %v117_v23, %v114_v18  ;;  %v58_v43 = vsel %vm57_vm2, %v55_v35, 0.0  ;;  %v138_v47 = vmul.f32 %v137_v42, %v137_v42  ;;  %v151_v48 = vld [vmem:[%s358_s7] sm:$0x1] }
   0xb   :  { %v41_v28 = vadd.f32 %v40_v24, %v39_v21  ;;  %v78_v29 = vrot.slane %v77_v25, 2  ;;  %v95_v45 = vsel %vm57_vm2, %v93_v39, 0.0  ;;  %v165_v49 = vld [vmem:[%s359_s8] sm:$0x1]  ;;  %v152_v51 = vmul.f32 %v151_v48, %v151_v48  ;;  %s239_s8 = smov [#allocation3]  }
   0xc   :  { %v120_v31 = vadd.f32 %v119_v26, %v118_v27  ;;  %v140_v53 = vsel %vm57_vm2, %v138_v47, 0.0  ;;  %v166_v54 = vmul.f32 %v165_v49, %v165_v49  ;;  %v180_v47 = vstv %s351_s0  ;;  %s190_s30 = sshll.u32 %s239_s8, 4  ;;  %s191_s30 = int_to_ptr.vmem [resolvable:$true] %s190_s30 }
   0xd   :  { %v42_v32 = vrot.slane %v41_v28, 1  ;;  %v79_v33 = vadd.f32 %v78_v29, %v77_v25  ;;  %v154_v55 = vsel %vm57_vm2, %v152_v51, 0.0  ;;  %s215_s10 = scalar_lea.vmem %s191_s30, 16  ;;  %s219_s11 = scalar_lea.vmem %s191_s30, 32 }
   0xe   :  { %v121_v36 = vrot.slane %v120_v31, 4  ;;  %v168_v56 = vsel %vm57_vm2, %v166_v54, 0.0  ;;  %p216_p0 = scmp.ne.s32.totalorder %s191_s30, %s215_s10  ;;  %p220_p1 = scmp.lt.s32.totalorder %s191_s30, %s191_s30 }
   0xf   :  { %v43_v37 = vadd.f32 %v42_v32, %v41_v28  ;;  %v80_v38 = vrot.slane %v79_v33, 1  ;;  %p221_p2 = scmp.lt.s32.totalorder %s219_s11, %s215_s10 }
  0x10   :  { %v122_v40 = vadd.f32 %v121_v36, %v120_v31 }
  0x11   :  { %44 = vadd.xlane.f32.xlu0 %v43_v37  ;;  %v81_v41 = vadd.f32 %v80_v38, %v79_v33  ;;  %p222_p3 = por %p221_p2, %p220_p1 }
  0x12   :  { %v123_v44 = vrot.slane %v122_v40, 2 }
  0x13   :  { %82 = vadd.xlane.f32.xlu1 %v81_v41  ;;  %p223_p4 = pnand %p222_p3, %p216_p0 }
  0x14   :  { %v124_v46 = vadd.f32 %v123_v44, %v122_v40 }
  0x15   :  { %59 = vadd.xlane.f32.xlu0 %v58_v43 }
  0x16   :  { %v125_v50 = vrot.slane %v124_v46, 1 }
  0x17   :  { %96 = vadd.xlane.f32.xlu1 %v95_v45 }
  0x18   :  { %v126_v52 = vadd.f32 %v125_v50, %v124_v46 }
  0x1a   :  { %127 = vadd.xlane.f32.xlu0 %v126_v52 }
  0x1b   :  { %141 = vadd.xlane.f32.xlu1 %v140_v53 }
  0x1e   :  { %155 = vadd.xlane.f32.xlu0 %v154_v55 }
  0x1f   :  { %169 = vadd.xlane.f32.xlu1 %v168_v56 }
  0x9e   :  { %v45_v57 = vpop.xlane.xlu0 %44 }
  0x9f   :  { %199 = vrsqrt.f32 %v45_v57  ;;  %vm48_vm3 = vcmp.eq.f32.partialorder %v45_v57, inf  ;;  %vm50_vm4 = vcmp.eq.f32.partialorder %v45_v57, 0.0  ;;  %v51_v9 = vand.u32 2147483648, %v45_v57 }
  0xa0   :  { %v83_v58 = vpop.xlane.xlu1 %82 }
  0xa1   :  { %201 = vrsqrt.f32 %v83_v58  ;;  %vm86_vm5 = vcmp.eq.f32.partialorder %v83_v58, inf  ;;  %v89_v15 = vand.u32 2147483648, %v83_v58  ;;  %vm88_vm9 = vcmp.eq.f32.partialorder %v83_v58, 0.0 }
  0xa2   :  { %v60_v59 = vpop.xlane.xlu0 %59 }
  0xa3   :  { %203 = vrsqrt.f32 %v60_v59  ;;  %vm63_vm6 = vcmp.eq.f32.partialorder %v60_v59, inf  ;;  %v66_v10 = vand.u32 2147483648, %v60_v59  ;;  %vm65_vm7 = vcmp.eq.f32.partialorder %v60_v59, 0.0 }
  0xa4   :  { %v97_v60 = vpop.xlane.xlu1 %96 }
  0xa5   :  { %205 = vrsqrt.f32 %v97_v60  ;;  %vm100_vm8 = vcmp.eq.f32.partialorder %v97_v60, inf  ;;  %v103_v22 = vand.u32 2147483648, %v97_v60  ;;  %vm102_vm10 = vcmp.eq.f32.partialorder %v97_v60, 0.0 }
  0xa7   :  { %v128_v61 = vpop.xlane.xlu0 %127 }
  0xa8   :  { %207 = vrsqrt.f32 %v128_v61  ;;  %v142_v62 = vpop.xlane.xlu1 %141  ;;  %vm131_vm11 = vcmp.eq.f32.partialorder %v128_v61, inf  ;;  %v134_v28 = vand.u32 2147483648, %v128_v61  ;;  %vm133_vm13 = vcmp.eq.f32.partialorder %v128_v61, 0.0 }
  0xa9   :  { %v200_v63 = vpop.eup %199  ;;  %209 = vrsqrt.f32 %v142_v62  ;;  %vm145_vm12 = vcmp.eq.f32.partialorder %v142_v62, inf  ;;  %v148_v33 = vand.u32 2147483648, %v142_v62  ;;  %vm147_vm14 = vcmp.eq.f32.partialorder %v142_v62, 0.0 }
  0xaa   :  { %v47_v0 = vmul.f32 %v200_v63, %v45_v57 }
  0xab   :  { %v202_v1 = vpop.eup %201  ;;  %v156_v2 = vpop.xlane.xlu0 %155 }
  0xac   :  { %v85_v3 = vmul.f32 %v202_v1, %v83_v58  ;;  %211 = vrsqrt.f32 %v156_v2  ;;  %v170_v4 = vpop.xlane.xlu1 %169  ;;  %v49_v6 = vsel %vm48_vm3, %v45_v57, %v47_v0  ;;  %vm159_vm15 = vcmp.eq.f32.partialorder %v156_v2, inf }
  0xad   :  { %v204_v5 = vpop.eup %203  ;;  %213 = vrsqrt.f32 %v170_v4  ;;  %v52_v14 = vsel %vm50_vm4, %v51_v9, %v49_v6  ;;  %v162_v39 = vand.u32 2147483648, %v156_v2  ;;  %vm173_vm0 = vcmp.eq.f32.partialorder %v170_v4, inf }
  0xae   :  { %v62_v7 = vmul.f32 %v204_v5, %v60_v59  ;;  %v87_v11 = vsel %vm86_vm5, %v83_v58, %v85_v3  ;;  %vm161_vm1 = vcmp.eq.f32.partialorder %v156_v2, 0.0  ;;  %v176_v43 = vand.u32 2147483648, %v170_v4 }
  0xaf   :  { %v206_v8 = vpop.eup %205  ;;  %v90_v21 = vsel %vm88_vm9, %v89_v15, %v87_v11  ;;  %vm175_vm2 = vcmp.eq.f32.partialorder %v170_v4, 0.0  ;;  %vm182_vm3 = vcmask 0  }
  0xb0   :  { %v64_v12 = vsel %vm63_vm6, %v60_v59, %v62_v7  ;;  %v99_v13 = vmul.f32 %v206_v8, %v97_v60 }
  0xb1   :  { %v67_v16 = vsel %vm65_vm7, %v66_v10, %v64_v12 }
  0xb2   :  { %v208_v17 = vpop.eup %207  ;;  %v68_v18 = vadd.f32 %v67_v16, %v52_v14  ;;  %v101_v19 = vsel %vm100_vm8, %v97_v60, %v99_v13 }
  0xb3   :  { %v210_v20 = vpop.eup %209  ;;  %v130_v23 = vmul.f32 %v208_v17, %v128_v61  ;;  %v104_v26 = vsel %vm102_vm10, %v103_v22, %v101_v19 }
  0xb4   :  { %v144_v24 = vmul.f32 %v210_v20, %v142_v62  ;;  %v91_v25 = vadd.f32 %v90_v21, %v68_v18 }
  0xb5   :  { %v132_v27 = vsel %vm131_vm11, %v128_v61, %v130_v23 }
  0xb6   :  { %v212_v29 = vpop.eup %211  ;;  %v146_v30 = vsel %vm145_vm12, %v142_v62, %v144_v24  ;;  %v105_v31 = vadd.f32 %v104_v26, %v91_v25  ;;  %v135_v35 = vsel %vm133_vm13, %v134_v28, %v132_v27 }
  0xb7   :  { %v214_v32 = vpop.eup %213  ;;  %v158_v34 = vmul.f32 %v212_v29, %v156_v2  ;;  %v149_v40 = vsel %vm147_vm14, %v148_v33, %v146_v30 }
  0xb8   :  { %v172_v36 = vmul.f32 %v214_v32, %v170_v4  ;;  %v136_v37 = vadd.f32 %v135_v35, %v105_v31 }
  0xb9   :  { %v160_v38 = vsel %vm159_vm15, %v156_v2, %v158_v34 }
  0xba   :  { %v174_v41 = vsel %vm173_vm0, %v170_v4, %v172_v36  ;;  %v150_v42 = vadd.f32 %v149_v40, %v136_v37  ;;  %v163_v44 = vsel %vm161_vm1, %v162_v39, %v160_v38 }
  0xbb   :  { %v177_v46 = vsel %vm175_vm2, %v176_v43, %v174_v41 }
  0xbc   :  { %v164_v45 = vadd.f32 %v163_v44, %v150_v42 }
  0xbe   :  { %v178_v48 = vadd.f32 %v177_v46, %v164_v45 }
  0xc0   :  { %v181_v49 = vmul.f32 %v180_v47, %v178_v48 }
  0xc2   :  { %183 = vst.msk [vmem:[#allocation3] sm:$0x1] %vm182_vm3, %v181_v49 }
  0xc3   :  { %226 = shalt.err (!%p223_p4)
}
  0xc4   :  { %s227_s14 = scalar_lea.hbm %s360_s9, 16 }
  0xc5   :  { %p228_p5 = scmp.ne.s32.totalorder %s360_s9, %s227_s14  ;;  %p231_p6 = scmp.lt.u32.totalorder %s227_s14, %s360_s9 }
  0xc7   :  { %p233_p7 = pnand %p231_p6, %p228_p5 }
  0xc9   :  { %236 = shalt.err (!%p233_p7)
}
  0xca   :  { %193 = dma.vmem_to_hbm [thread:$0]  %s191_s30, 16, %s360_s9, [#allocation4]  }
  0xcb   :  { %237 = dma.done.wait [#allocation4], 16  }
  0xcc   :  { %238 = vsyncadd [#allocation4], 4294967280 }
  0xcd   :  { %197 = vsyncpa [#allocation4], 1 }

</bundles_post_ra>
